<compile_context>
chip_gen: v5e
topology: v5e:2x2
jax: 0.10.0
libtpu: 0.0.40
codegen_flags: <defaults>
</compile_context>

<pallas_src>
import math

import jax
import jax.numpy as jnp
from jax.experimental import pallas as pl
from jax.experimental.pallas import tpu as pltpu


def _sage_gcn_kernel(a_ref, x_ref, inv_ref, wt_ref, b_ref, o_ref, acc_ref):
    """Grid = (dst_tiles, src_tiles); src axis is the reduction (last)."""
    k = pl.program_id(1)

    @pl.when(k == 0)
    def _():
        acc_ref[...] = jnp.zeros_like(acc_ref)

    # Aggregation: acc[d, :] += sum_s (A+I)[d, s] * x[s, :]
    # bf16 operands, f32 accumulation on the MXU.
    acc_ref[...] += jnp.dot(a_ref[...], x_ref[...],
                            preferred_element_type=jnp.float32)

    @pl.when(k == pl.num_programs(1) - 1)
    def _():
        # Normalize by precomputed 1/(deg+1), project with the pre-transposed
        # lane-dense weight, add bias, store full-lane (128-wide) output.
        h = acc_ref[...] * inv_ref[...]                        # (tm, Fin) f32
        out = jnp.dot(h, wt_ref[...],
                      preferred_element_type=jnp.float32) + b_ref[...]
        o_ref[...] = out.astype(o_ref.dtype)


def _round_up(v, m):
    return ((v + m - 1) // m) * m


def graphsage_gcn_forward(adj, x, w_neigh, b_neigh, *, tm=256, tk=512):
    """adj: [N,N] f32 (0/1, no self loops), x: [N,Fin] f32,
    w_neigh: [Fout,Fin] f32, b_neigh: [Fout] f32."""
    n, fin = x.shape
    fout = w_neigh.shape[0]
    fout_pad = _round_up(fout, 128)          # lane-dense output width

    # Tile sizes: multiples of 128, no larger than the 128-aligned N.
    n128 = _round_up(n, 128)
    tm = max(128, min(_round_up(tm, 128), n128))
    tk = max(128, min(_round_up(tk, 128), n128))
    n_pad = _round_up(n, math.lcm(tm, tk))   # padded node count (tile-divisible)

    # ---- Graph / parameter preprocessing (pure layout plumbing, done once) ----
    # Fold the self-loop into the adjacency and precompute 1/(deg+1) so the
    # kernel never row-reduces the N x N operand. Padded rows have zero degree
    # -> guard the divide; their outputs are sliced away anyway.
    adj_sl = adj + jnp.eye(n, dtype=adj.dtype)                       # A + I
    degs = jnp.sum(adj_sl, axis=-1, keepdims=True)
    inv_norm = (1.0 / jnp.maximum(degs, 1.0)).astype(jnp.float32)

    adj_bf16 = jnp.zeros((n_pad, n_pad), jnp.bfloat16).at[:n, :n].set(
        adj_sl.astype(jnp.bfloat16))          # 0/1 values: exact in bf16
    x_bf16 = jnp.zeros((n_pad, fin), jnp.bfloat16).at[:n, :].set(
        x.astype(jnp.bfloat16))
    inv_pad = jnp.ones((n_pad, 1), jnp.float32).at[:n, :].set(inv_norm)

    # Pre-transposed, zero-padded weight [Fin, Fout_pad] and bias [1, Fout_pad].
    w_t_pad = jnp.zeros((fin, fout_pad), jnp.float32).at[:, :fout].set(
        w_neigh.T.astype(jnp.float32))
    b_pad = jnp.zeros((1, fout_pad), jnp.float32).at[0, :fout].set(
        b_neigh.astype(jnp.float32))

    grid = (n_pad // tm, n_pad // tk)

    out_pad = pl.pallas_call(
        _sage_gcn_kernel,
        out_shape=jax.ShapeDtypeStruct((n_pad, fout_pad), jnp.float32),
        grid_spec=pltpu.PrefetchScalarGridSpec(
            num_scalar_prefetch=0,
            grid=grid,
            in_specs=[
                pl.BlockSpec((tm, tk), lambda i, k: (i, k)),         # (A+I) tile
                pl.BlockSpec((tk, fin), lambda i, k: (k, 0)),        # x src tile
                pl.BlockSpec((tm, 1), lambda i, k: (i, 0)),          # 1/(deg+1)
                pl.BlockSpec((fin, fout_pad), lambda i, k: (0, 0)),  # W^T padded
                pl.BlockSpec((1, fout_pad), lambda i, k: (0, 0)),    # bias padded
            ],
            out_specs=pl.BlockSpec((tm, fout_pad), lambda i, k: (i, 0)),
            scratch_shapes=[pltpu.VMEM((tm, fin), jnp.float32)],
        ),
        compiler_params=pltpu.CompilerParams(
            dimension_semantics=("parallel", "arbitrary"),
            vmem_limit_bytes=32 * 1024 * 1024,
        ),
    )(adj_bf16, x_bf16, inv_pad, w_t_pad, b_pad)

    return out_pad[:n, :fout]


def _reference(adj, x, w_neigh, b_neigh):
    neigh = adj @ x
    degs = adj.sum(axis=-1, keepdims=True)
    h = (neigh + x) / (degs + 1.0)
    return h @ w_neigh.T + b_neigh[None, :]


if __name__ == "__main__":
    key = jax.random.PRNGKey(0)
    k_adj, k_x, k_w, k_b = jax.random.split(key, 4)

    N = 256          # number of graph nodes
    IN_FEATS = 32
    OUT_FEATS = 16

    # Deterministic random directed graph (no self loops; dense adjacency).
    adj = (jax.random.uniform(k_adj, (N, N)) < 0.1).astype(jnp.float32)
    adj = adj * (1.0 - jnp.eye(N, dtype=jnp.float32))

    # Node features and deterministic parameters (synthetic init).
    x = jax.random.normal(k_x, (N, IN_FEATS), dtype=jnp.float32)
    w_neigh = jax.random.normal(k_w, (OUT_FEATS, IN_FEATS), dtype=jnp.float32) * 0.1
    b_neigh = jax.random.normal(k_b, (OUT_FEATS,), dtype=jnp.float32) * 0.1

    out = graphsage_gcn_forward(adj, x, w_neigh, b_neigh)
    out = jax.block_until_ready(out)

    ref = _reference(adj, x, w_neigh, b_neigh)
    assert out.shape == (N, OUT_FEATS)
    # Tolerance relaxed vs pure f32: features travel bf16 through the
    # aggregation matmul (adjacency 0/1 stays exact; accumulation is f32).
    assert jnp.allclose(out, ref, atol=2e-2, rtol=2e-2), (
        float(jnp.max(jnp.abs(out - ref))))

    print("KERNEL_OK")
</pallas_src>

<mosaic_0001>
module attributes {stable_mosaic.version = 11 : i64} {
  func.func @_sage_gcn_kernel(%arg0: i32, %arg1: i32, %arg2: memref<256x256xbf16, #tpu.memory_space<vmem>>, %arg3: memref<256x32xbf16, #tpu.memory_space<vmem>>, %arg4: memref<256x1xf32, #tpu.memory_space<vmem>>, %arg5: memref<32x128xf32, #tpu.memory_space<vmem>>, %arg6: memref<1x128xf32, #tpu.memory_space<vmem>>, %arg7: memref<256x128xf32, #tpu.memory_space<vmem>>, %arg8: memref<256x32xf32, #tpu.memory_space<vmem>>) attributes {dimension_semantics = [#tpu.dimension_semantics<parallel>, #tpu.dimension_semantics<arbitrary>], iteration_bounds = array<i64: 1, 1>, scalar_prefetch = 0 : i64, scratch_operands = 1 : i64, tpu.core_type = #tpu.core_type<tc>, window_params = [{transform_indices = @transform_0, window_bounds = array<i64: 256, 256>}, {transform_indices = @transform_1, window_bounds = array<i64: 256, 32>}, {transform_indices = @transform_2, window_bounds = array<i64: 256, 1>}, {pipeline_mode = #tpu.pipeline_mode<synchronous>, transform_indices = @transform_3, window_bounds = array<i64: 32, 128>}, {pipeline_mode = #tpu.pipeline_mode<synchronous>, transform_indices = @transform_4, window_bounds = array<i64: 1, 128>}, {transform_indices = @transform_5, window_bounds = array<i64: 256, 128>}]} {
    %c0_i32 = arith.constant 0 : i32
    %0 = arith.cmpi eq, %arg1, %c0_i32 : i32
    %1 = arith.extui %0 : i1 to i32
    %c0_i32_0 = arith.constant 0 : i32
    %2 = arith.cmpi ne, %1, %c0_i32_0 : i32
    scf.if %2 {
      %cst_10 = arith.constant 0.000000e+00 : f32
      %12 = vector.broadcast %cst_10 : f32 to vector<256x32xf32>
      %c0_11 = arith.constant 0 : index
      %c0_12 = arith.constant 0 : index
      %13 = vector.load %arg8[%c0_11, %c0_12] : memref<256x32xf32, #tpu.memory_space<vmem>>, vector<256x32xf32>
      tpu.vector_store %arg8[%c0_11, %c0_12], %12 {strides = array<i32>} : memref<256x32xf32, #tpu.memory_space<vmem>>, vector<256x32xf32>,
    } else {
    }
    %c0 = arith.constant 0 : index
    %c0_1 = arith.constant 0 : index
    %3 = vector.load %arg8[%c0, %c0_1] : memref<256x32xf32, #tpu.memory_space<vmem>>, vector<256x32xf32>
    %c0_2 = arith.constant 0 : index
    %c0_3 = arith.constant 0 : index
    %4 = vector.load %arg2[%c0_2, %c0_3] : memref<256x256xbf16, #tpu.memory_space<vmem>>, vector<256x256xbf16>
    %c0_4 = arith.constant 0 : index
    %c0_5 = arith.constant 0 : index
    %5 = vector.load %arg3[%c0_4, %c0_5] : memref<256x32xbf16, #tpu.memory_space<vmem>>, vector<256x32xbf16>
    %cst = arith.constant dense<0.000000e+00> : vector<256x32xf32>
    %6 = tpu.matmul %4, %5, %cst {dimension_numbers = #tpu.dot_dimension_numbers<[1], [0], [0], [1], [0, 0, 1, 1], [], []>} : vector<256x256xbf16>, vector<256x32xbf16>, vector<256x32xf32> -> vector<256x32xf32>
    %7 = arith.addf %3, %6 : vector<256x32xf32>
    %c0_6 = arith.constant 0 : index
    %c0_7 = arith.constant 0 : index
    %8 = vector.load %arg8[%c0_6, %c0_7] : memref<256x32xf32, #tpu.memory_space<vmem>>, vector<256x32xf32>
    tpu.vector_store %arg8[%c0_6, %c0_7], %7 {strides = array<i32>} : memref<256x32xf32, #tpu.memory_space<vmem>>, vector<256x32xf32>,
    %c0_i32_8 = arith.constant 0 : i32
    %9 = arith.cmpi eq, %arg1, %c0_i32_8 : i32
    %10 = arith.extui %9 : i1 to i32
    %c0_i32_9 = arith.constant 0 : i32
    %11 = arith.cmpi ne, %10, %c0_i32_9 : i32
    scf.if %11 {
      %c0_10 = arith.constant 0 : index
      %c0_11 = arith.constant 0 : index
      %12 = vector.load %arg8[%c0_10, %c0_11] : memref<256x32xf32, #tpu.memory_space<vmem>>, vector<256x32xf32>
      %c0_12 = arith.constant 0 : index
      %c0_13 = arith.constant 0 : index
      %13 = vector.load %arg4[%c0_12, %c0_13] : memref<256x1xf32, #tpu.memory_space<vmem>>, vector<256x1xf32>
      %14 = vector.broadcast %13 : vector<256x1xf32> to vector<256x32xf32>
      %15 = arith.mulf %12, %14 : vector<256x32xf32>
      %c0_14 = arith.constant 0 : index
      %c0_15 = arith.constant 0 : index
      %16 = vector.load %arg5[%c0_14, %c0_15] : memref<32x128xf32, #tpu.memory_space<vmem>>, vector<32x128xf32>
      %cst_16 = arith.constant dense<0.000000e+00> : vector<256x128xf32>
      %17 = tpu.matmul %15, %16, %cst_16 {dimension_numbers = #tpu.dot_dimension_numbers<[1], [0], [0], [1], [0, 0, 1, 1], [], []>} : vector<256x32xf32>, vector<32x128xf32>, vector<256x128xf32> -> vector<256x128xf32>
      %c0_17 = arith.constant 0 : index
      %c0_18 = arith.constant 0 : index
      %18 = vector.load %arg6[%c0_17, %c0_18] : memref<1x128xf32, #tpu.memory_space<vmem>>, vector<1x128xf32>
      %19 = vector.broadcast %18 : vector<1x128xf32> to vector<256x128xf32>
      %20 = arith.addf %17, %19 : vector<256x128xf32>
      %c0_19 = arith.constant 0 : index
      %c0_20 = arith.constant 0 : index
      %21 = vector.load %arg7[%c0_19, %c0_20] : memref<256x128xf32, #tpu.memory_space<vmem>>, vector<256x128xf32>
      tpu.vector_store %arg7[%c0_19, %c0_20], %20 {strides = array<i32>} : memref<256x128xf32, #tpu.memory_space<vmem>>, vector<256x128xf32>,
    } else {
    }
    return
  }
  func.func @transform_0(%arg0: i32, %arg1: i32) -> (i32, i32) {
    %c0_i32 = arith.constant 0 : i32
    return %arg0, %arg1 : i32, i32
  }
  func.func @transform_1(%arg0: i32, %arg1: i32) -> (i32, i32) {
    %c0_i32 = arith.constant 0 : i32
    %c0_i32_0 = arith.constant 0 : i32
    return %arg1, %c0_i32 : i32, i32
  }
  func.func @transform_2(%arg0: i32, %arg1: i32) -> (i32, i32) {
    %c0_i32 = arith.constant 0 : i32
    %c0_i32_0 = arith.constant 0 : i32
    return %arg0, %c0_i32 : i32, i32
  }
  func.func @transform_3(%arg0: i32, %arg1: i32) -> (i32, i32) {
    %c0_i32 = arith.constant 0 : i32
    %c0_i32_0 = arith.constant 0 : i32
    %c0_i32_1 = arith.constant 0 : i32
    return %c0_i32, %c0_i32_0 : i32, i32
  }
  func.func @transform_4(%arg0: i32, %arg1: i32) -> (i32, i32) {
    %c0_i32 = arith.constant 0 : i32
    %c0_i32_0 = arith.constant 0 : i32
    %c0_i32_1 = arith.constant 0 : i32
    return %c0_i32, %c0_i32_0 : i32, i32
  }
  func.func @transform_5(%arg0: i32, %arg1: i32) -> (i32, i32) {
    %c0_i32 = arith.constant 0 : i32
    %c0_i32_0 = arith.constant 0 : i32
    return %arg0, %c0_i32 : i32, i32
  }
}

</mosaic_0001>

<bundles_post_ra>
// kernel: tpu_custom_call.1
= control target key start
LH: loop header
LB: loop body
LE: loop exit
PB: predicated region body
PF: predicated region fallthrough
CT: control target
= control target key end

     0   :  { %v1506_v3 = vmov 0   ;;  %s2158_s0 = inlined_call_operand.vmem [shape: bf16[256,256], index: 0, kind: input, shape index: {}]   ;;  %s2159_s1 = inlined_call_operand.vmem [shape: bf16[256,32], index: 1, kind: input, shape index: {}]   ;;  %s2160_s2 = inlined_call_operand.vmem [shape: f32[256,1], index: 2, kind: input, shape index: {}]   ;;  %s2161_s3 = inlined_call_operand.vmem [shape: f32[32,128], index: 3, kind: input, shape index: {}]   ;;  %s2162_s4 = inlined_call_operand.vmem [shape: f32[1,128], index: 4, kind: input, shape index: {}]   ;;  %s2163_s5 = inlined_call_operand.hbm [shape: f32[256,128], index: 5, kind: output, shape index: {}]  }
   0x1   :  { %v690_v0 = vld [vmem:[%s2160_s2 + $0x10] sm:$0xff]  ;;  %v688_v1 = vld [vmem:[%s2160_s2] sm:$0xff]  ;;  %v1442_v2 = vld [vmem:[%s2159_s1 + $0x38] sm:$0xff]  ;;  %1477 = vset.pattern.permute.xlu1 %v1506_v3  ;;  %1476 = vset.pattern.permute.xlu0 %v1506_v3 }
   0x2   :  { %v1553_v4 = vld [vmem:[%s2159_s1 + $0x78] sm:$0xff]  ;;  %732 = vperm.xlu1 %1477, %v690_v0   ;;  %722 = vperm.xlu0 %1476, %v688_v1   ;;  %v1441_v5 = vld [vmem:[%s2159_s1 + $0x30] sm:$0xff]  ;;  %v689_v8 = vld [vmem:[%s2160_s2 + $0x8] sm:$0xff] }
   0x3   :  { %410 = vmatpush.bf16.msra.mxu0 %v1442_v2  ;;  %1451 = vmatpush.bf16.msra.mxu3 %v1442_v2  ;;  %v1562_v6 = vld [vmem:[%s2159_s1 + $0x70] sm:$0xff]  ;;  %v691_v7 = vld [vmem:[%s2160_s2 + $0x18] sm:$0xff]  ;;  %v1440_v9 = vld [vmem:[%s2159_s1 + $0x28] sm:$0xff] }
   0x4   :  { %499 = vmatpush.bf16.msra.mxu1 %v1553_v4  ;;  %1478 = vset.pattern.permute.xlu2 %v1506_v3  ;;  %v1577_v10 = vld [vmem:[%s2159_s1 + $0x68] sm:$0xff]  ;;  %v692_v11 = vld [vmem:[%s2160_s2 + $0x20] sm:$0xff] }
   0x5   :  { %v1439_v12 = vld [vmem:[%s2159_s1 + $0x20] sm:$0xff]  ;;  %742 = vperm.xlu2 %1478, %v692_v11  }
   0x6   :  { %v1589_v13 = vld [vmem:[%s2159_s1 + $0x60] sm:$0xff] }
   0x7   :  { %411 = vmatpush.bf16.msra.mxu0 %v1441_v5  ;;  %1452 = vmatpush.bf16.msra.mxu3 %v1441_v5 }
   0x8   :  { %500 = vmatpush.bf16.msra.mxu1 %v1562_v6 }
   0xa   :  { %737 = vperm.xlu1 %1477, %v691_v7   ;;  %727 = vperm.xlu0 %1476, %v689_v8  }
   0xb   :  { %412 = vmatpush.bf16.msra.mxu0 %v1440_v9  ;;  %1453 = vmatpush.bf16.msra.mxu3 %v1440_v9 }
   0xc   :  { %501 = vmatpush.bf16.msra.mxu1 %v1577_v10 }
   0xd   :  { %10 = vsyncpa [#allocation4], 0  ;;  %v695_v14 = vld [vmem:[%s2160_s2 + $0x38] sm:$0xff]  ;;  %v694_v15 = vld [vmem:[%s2160_s2 + $0x30] sm:$0xff]  ;;  %vm25_vm0 = vcmask 261120   ;;  %s1167_s16 = sshll.u32 %s2163_s5, 4  ;;  %s1168_s16 = int_to_ptr.hbm [resolvable:$true] %s1167_s16 }
   0xe   :  { %v1438_v16 = vld [vmem:[%s2159_s1 + $0x18] sm:$0xff]  ;;  %v693_v18 = vld [vmem:[%s2160_s2 + $0x28] sm:$0xff]  ;;  %v1437_v19 = vld [vmem:[%s2159_s1 + $0x10] sm:$0xff]  ;;  %s1509_s17 = smov 128   ;;  %s1510_s18 = smov 8  }
   0xf   :  { %413 = vmatpush.bf16.msra.mxu0 %v1439_v12  ;;  %1454 = vmatpush.bf16.msra.mxu3 %v1439_v12  ;;  %v1604_v17 = vld [vmem:[%s2159_s1 + $0x58] sm:$0xff]  ;;  %v1616_v20 = vld [vmem:[%s2159_s1 + $0x50] sm:$0xff]  ;;  %v697_v22 = vld [vmem:[%s2160_s2 + $0x48] sm:$0xff] }
  0x10   :  { %502 = vmatpush.bf16.msra.mxu1 %v1589_v13  ;;  %747 = vperm.xlu2 %1478, %v693_v18   ;;  %v698_v21 = vld [vmem:[%s2160_s2 + $0x50] sm:$0xff]  ;;  %v1436_v23 = vld [vmem:[%s2159_s1 + $0x8] sm:$0xff]  ;;  %v696_v25 = vld [vmem:[%s2160_s2 + $0x40] sm:$0xff] }
  0x11   :  { %v1631_v24 = vld [vmem:[%s2159_s1 + $0x48] sm:$0xff]  ;;  %v1435_v26 = vld [vmem:[%s2159_s1] sm:$0xff]  ;;  %v699_v39 = vld [vmem:[%s2160_s2 + $0x58] sm:$0xff] }
  0x12   :  { %757 = vperm.xlu1 %1477, %v695_v14   ;;  %752 = vperm.xlu0 %1476, %v694_v15   ;;  %v1642_v27 = vld [vmem:[%s2159_s1 + $0x40] sm:$0xff]  ;;  %v1404_v29 = vld [vmem:[%s2158_s0 + $0x4] sm:$0xf0]  ;;  %v1183_v33 = vld [vmem:[%s2158_s0 + $0x8] sm:$0xf0] }
  0x13   :  { %414 = vmatpush.bf16.msra.mxu0 %v1438_v16  ;;  %1455 = vmatpush.bf16.msra.mxu3 %v1438_v16  ;;  %v1181_v28 = vld [vmem:[%s2158_s0] sm:$0xf]  ;;  %v1428_v31 = vld [vmem:[%s2158_s0 + $0xc4] sm:$0xf0]  ;;  %v1403_v32 = vld [vmem:[%s2158_s0 + $0x4] sm:$0xf] }
  0x14   :  { %503 = vmatpush.bf16.msra.mxu1 %v1604_v17  ;;  %v1277_v30 = vld [vmem:[%s2158_s0 + $0xc0] sm:$0xf]  ;;  %v701_v34 = vld [vmem:[%s2160_s2 + $0x68] sm:$0xff]  ;;  %v1182_v36 = vor.u32 %v1404_v29, %v1181_v28  ;;  %v1186_v38 = vor.u32 %v1403_v32, %v1183_v33  ;;  %v703_v41 = vld [vmem:[%s2160_s2 + $0x78] sm:$0xff] }
  0x15   :  { %v700_v35 = vld [vmem:[%s2160_s2 + $0x60] sm:$0xff]  ;;  %v1278_v37 = vor.u32 %v1428_v31, %v1277_v30  ;;  %v702_v42 = vld [vmem:[%s2160_s2 + $0x70] sm:$0xff]  ;;  %v1406_v44 = vld [vmem:[%s2158_s0 + $0x14] sm:$0xf0] }
  0x16   :  { %v704_v40 = vld [vmem:[%s2160_s2 + $0x80] sm:$0xff]  ;;  %v1189_v43 = vld [vmem:[%s2158_s0 + $0x10] sm:$0xf]  ;;  %v1430_v46 = vld [vmem:[%s2158_s0 + $0xd4] sm:$0xf0] }
  0x17   :  { %415 = vmatpush.bf16.msra.mxu0 %v1437_v19  ;;  %1456 = vmatpush.bf16.msra.mxu3 %v1437_v19  ;;  %v1285_v45 = vld [vmem:[%s2158_s0 + $0xd0] sm:$0xf]  ;;  %v1405_v47 = vld [vmem:[%s2158_s0 + $0x14] sm:$0xf]  ;;  %v1191_v48 = vld [vmem:[%s2158_s0 + $0x18] sm:$0xf0]  ;;  %v1190_v51 = vor.u32 %v1406_v44, %v1189_v43 }
  0x18   :  { %504 = vmatpush.bf16.msra.mxu1 %v1616_v20  ;;  %762 = vperm.xlu2 %1478, %v696_v25   ;;  %v707_v49 = vld [vmem:[%s2160_s2 + $0x98] sm:$0xff]  ;;  %v706_v50 = vld [vmem:[%s2160_s2 + $0x90] sm:$0xff]  ;;  %v1286_v52 = vor.u32 %v1430_v46, %v1285_v45  ;;  %v1194_v53 = vor.u32 %v1405_v47, %v1191_v48  ;;  %v705_v54 = vld [vmem:[%s2160_s2 + $0x88] sm:$0xff]  ;;  %v1507_v43 = vmov 0.0  }
  0x19   :  { %v710_v55 = vld [vmem:[%s2160_s2 + $0xb0] sm:$0xff]  ;;  %v709_v56 = vld [vmem:[%s2160_s2 + $0xa8] sm:$0xff]  ;;  %v708_v57 = vld [vmem:[%s2160_s2 + $0xa0] sm:$0xff]  ;;  %26 = vst.msk [vmem:[#allocation2] sm:$0xff] %vm25_vm0, %v1507_v43 }
  0x1a   :  { %772 = vperm.xlu1 %1477, %v698_v21   ;;  %767 = vperm.xlu0 %1476, %v697_v22   ;;  %v1197_v58 = vld [vmem:[%s2158_s0 + $0x20] sm:$0xf]  ;;  %v1408_v59 = vld [vmem:[%s2158_s0 + $0x24] sm:$0xf0]  ;;  %v1407_v62 = vld [vmem:[%s2158_s0 + $0x24] sm:$0xf] }
  0x1b   :  { %416 = vmatpush.bf16.msra.mxu0 %v1436_v23  ;;  %1457 = vmatpush.bf16.msra.mxu3 %v1436_v23  ;;  %v1293_v60 = vld [vmem:[%s2158_s0 + $0xe0] sm:$0xf]  ;;  %v1432_v61 = vld [vmem:[%s2158_s0 + $0xe4] sm:$0xf0]  ;;  %v1199_v63 = vld [vmem:[%s2158_s0 + $0x28] sm:$0xf0]  ;;  %v1198_v2 = vor.u32 %v1408_v59, %v1197_v58 }
  0x1c   :  { %505 = vmatpush.bf16.msra.mxu1 %v1631_v24  ;;  %v716_v0 = vld [vmem:[%s2160_s2 + $0xe0] sm:$0xff]  ;;  %v711_v1 = vld [vmem:[%s2160_s2 + $0xb8] sm:$0xff]  ;;  %v1294_v3 = vor.u32 %v1432_v61, %v1293_v60  ;;  %v717_v7 = vld [vmem:[%s2160_s2 + $0xe8] sm:$0xff]  ;;  %27 = vst.msk [vmem:[#allocation2 + $0x8] sm:$0xff] %vm25_vm0, %v1507_v43 }
  0x1d   :  { %v715_v5 = vld [vmem:[%s2160_s2 + $0xd8] sm:$0xff]  ;;  %v712_v8 = vld [vmem:[%s2160_s2 + $0xc0] sm:$0xff]  ;;  %v1205_v9 = vld [vmem:[%s2158_s0 + $0x30] sm:$0xf]  ;;  %28 = vst.msk [vmem:[#allocation2 + $0x10] sm:$0xff] %vm25_vm0, %v1507_v43 }
  0x1e   :  { %v1301_v11 = vld [vmem:[%s2158_s0 + $0xf0] sm:$0xf]  ;;  %v1434_v12 = vld [vmem:[%s2158_s0 + $0xf4] sm:$0xf0]  ;;  %v1207_v14 = vld [vmem:[%s2158_s0 + $0x38] sm:$0xf0] }
  0x1f   :  { %417 = vmatpush.bf16.msra.mxu0 %v1435_v26  ;;  %1458 = vmatpush.bf16.msra.mxu3 %v1435_v26  ;;  %v719_v15 = vld [vmem:[%s2160_s2 + $0xf8] sm:$0xff]  ;;  %v714_v16 = vld [vmem:[%s2160_s2 + $0xd0] sm:$0xff]  ;;  %v1302_v18 = vor.u32 %v1434_v12, %v1301_v11  ;;  %v1213_v21 = vld [vmem:[%s2158_s0 + $0x40] sm:$0xf]  ;;  %29 = vst.msk [vmem:[#allocation2 + $0x18] sm:$0xff] %vm25_vm0, %v1507_v43 }
  0x20   :  { %506 = vmatpush.bf16.msra.mxu1 %v1642_v27  ;;  %777 = vperm.xlu2 %1478, %v699_v39   ;;  %v1412_v22 = vld [vmem:[%s2158_s0 + $0x44] sm:$0xf0]  ;;  %v1427_v23 = vld [vmem:[%s2158_s0 + $0xc4] sm:$0xf]  ;;  %v1215_v26 = vld [vmem:[%s2158_s0 + $0x48] sm:$0xf0] }
  0x21   :  { %v1411_v25 = vld [vmem:[%s2158_s0 + $0x44] sm:$0xf]  ;;  %v1221_v30 = vld [vmem:[%s2158_s0 + $0x50] sm:$0xf]  ;;  %v1414_v31 = vld [vmem:[%s2158_s0 + $0x54] sm:$0xf0] }
  0x22   :  { %787 = vperm.xlu1 %1477, %v701_v34   ;;  %782 = vperm.xlu0 %1476, %v700_v35   ;;  %v1218_v29 = vor.u32 %v1411_v25, %v1215_v26  ;;  %v1429_v32 = vld [vmem:[%s2158_s0 + $0xd4] sm:$0xf]  ;;  %v1287_v33 = vld [vmem:[%s2158_s0 + $0xd8] sm:$0xf0]  ;;  %v1229_v39 = vld [vmem:[%s2158_s0 + $0x60] sm:$0xf] }
  0x23   :  { %1459 = vmatpush.bf16.msrb.mxu3 %v1553_v4  ;;  %418 = vmatmul.bf16.vlgmr.msra.gmra.mxu0 %v1182_v36  ;;  %v1202_v4 = vor.u32 %v1407_v62, %v1199_v63  ;;  %v1413_v34 = vld [vmem:[%s2158_s0 + $0x54] sm:$0xf]  ;;  %v1223_v35 = vld [vmem:[%s2158_s0 + $0x58] sm:$0xf0]  ;;  %v1222_v36 = vor.u32 %v1414_v31, %v1221_v30  ;;  %v1415_v44 = vld [vmem:[%s2158_s0 + $0x64] sm:$0xf] }
  0x24   :  { %478 = vmatmul.bf16.vlgmr.msra.gmra.mxu3 %v1278_v37  ;;  %507 = vmatmul.bf16.vlgmr.msra.gmra.mxu1 %v1186_v38  ;;  %v1290_v37 = vor.u32 %v1429_v32, %v1287_v33  ;;  %v1226_v38 = vor.u32 %v1413_v34, %v1223_v35  ;;  %v1231_v45 = vld [vmem:[%s2158_s0 + $0x68] sm:$0xf0]  ;;  %30 = vst.msk [vmem:[#allocation2 + $0x20] sm:$0xff] %vm25_vm0, %v1507_v43  ;;  %v912_v58 = vld [vmem:[%s2161_s3] sm:$0xff]  ;;  %v1420_v63 = vld [vmem:[%s2158_s0 + $0x84] sm:$0xf0] }
  0x25   :  { %v1234_v48 = vor.u32 %v1415_v44, %v1231_v45  ;;  %31 = vst.msk [vmem:[#allocation2 + $0x28] sm:$0xff] %vm25_vm0, %v1507_v43  ;;  %v1245_v62 = vld [vmem:[%s2158_s0 + $0x80] sm:$0xf]  ;;  %v59_v11 = vld [vmem:[#allocation2 + $0x8] sm:$0xff]  ;;  %v60_v26 = vld [vmem:[#allocation2 + $0x10] sm:$0xff] }
  0x26   :  { %32 = vst.msk [vmem:[#allocation2 + $0x30] sm:$0xff] %vm25_vm0, %v1507_v43  ;;  %v61_v35 = vld [vmem:[#allocation2 + $0x18] sm:$0xff]  ;;  %v1263_v44 = vld [vmem:[%s2158_s0 + $0xa8] sm:$0xf0] }
  0x27   :  { %1460 = vmatpush.bf16.msrb.mxu3 %v1562_v6  ;;  %v713_v6 = vld [vmem:[%s2160_s2 + $0xc8] sm:$0xff]  ;;  %33 = vst.msk [vmem:[#allocation2 + $0x38] sm:$0xff] %vm25_vm0, %v1507_v43 }
  0x28   :  { %792 = vperm.xlu2 %1478, %v702_v42   ;;  %v1295_v42 = vld [vmem:[%s2158_s0 + $0xe8] sm:$0xf0]  ;;  %34 = vst.msk [vmem:[#allocation2 + $0x40] sm:$0xff] %vm25_vm0, %v1507_v43 }
  0x29   :  { %35 = vst.msk [vmem:[#allocation2 + $0x48] sm:$0xff] %vm25_vm0, %v1507_v43 }
  0x2a   :  { %802 = vperm.xlu1 %1477, %v704_v40   ;;  %797 = vperm.xlu0 %1476, %v703_v41   ;;  %v1416_v40 = vld [vmem:[%s2158_s0 + $0x64] sm:$0xf0]  ;;  %v1431_v41 = vld [vmem:[%s2158_s0 + $0xe4] sm:$0xf]  ;;  %36 = vst.msk [vmem:[#allocation2 + $0x50] sm:$0xff] %vm25_vm0, %v1507_v43 }
  0x2b   :  { %1461 = vmatpush.bf16.msrb.mxu3 %v1577_v10  ;;  %v1410_v10 = vld [vmem:[%s2158_s0 + $0x34] sm:$0xf0]  ;;  %v1230_v46 = vor.u32 %v1416_v40, %v1229_v39  ;;  %v1298_v47 = vor.u32 %v1431_v41, %v1295_v42  ;;  %37 = vst.msk [vmem:[#allocation2 + $0x58] sm:$0xff] %vm25_vm0, %v1507_v43  ;;  %v1261_v40 = vld [vmem:[%s2158_s0 + $0xa0] sm:$0xf] }
  0x2c   :  { %38 = vst.msk [vmem:[#allocation2 + $0x60] sm:$0xff] %vm25_vm0, %v1507_v43  ;;  %v1424_v41 = vld [vmem:[%s2158_s0 + $0xa4] sm:$0xf0] }
  0x2d   :  { %39 = vst.msk [vmem:[#allocation2 + $0x68] sm:$0xff] %vm25_vm0, %v1507_v43 }
  0x2e   :  { %40 = vst.msk [vmem:[#allocation2 + $0x70] sm:$0xff] %vm25_vm0, %v1507_v43 }
  0x2f   :  { %1462 = vmatpush.bf16.msrb.mxu3 %v1589_v13  ;;  %v1409_v13 = vld [vmem:[%s2158_s0 + $0x34] sm:$0xf]  ;;  %41 = vst.msk [vmem:[#allocation2 + $0x78] sm:$0xff] %vm25_vm0, %v1507_v43 }
  0x30   :  { %807 = vperm.xlu2 %1478, %v705_v54   ;;  %v1210_v19 = vor.u32 %v1409_v13, %v1207_v14  ;;  %v1303_v54 = vld [vmem:[%s2158_s0 + $0xf8] sm:$0xf0]  ;;  %42 = vst.msk [vmem:[#allocation2 + $0x80] sm:$0xff] %vm25_vm0, %v1507_v43 }
  0x31   :  { %43 = vst.msk [vmem:[#allocation2 + $0x88] sm:$0xff] %vm25_vm0, %v1507_v43 }
  0x32   :  { %817 = vperm.xlu1 %1477, %v707_v49   ;;  %812 = vperm.xlu0 %1476, %v706_v50   ;;  %v915_v49 = vld [vmem:[%s2161_s3 + $0x18] sm:$0xff]  ;;  %v914_v50 = vld [vmem:[%s2161_s3 + $0x10] sm:$0xff]  ;;  %44 = vst.msk [vmem:[#allocation2 + $0x90] sm:$0xff] %vm25_vm0, %v1507_v43 }
  0x33   :  { %1463 = vmatpush.bf16.msrb.mxu3 %v1604_v17  ;;  %423 = vmatmul.bf16.gmra.mxu0 %v1190_v51  ;;  %v1206_v17 = vor.u32 %v1410_v10, %v1205_v9  ;;  %v1237_v51 = vld [vmem:[%s2158_s0 + $0x70] sm:$0xf]  ;;  %45 = vst.msk [vmem:[#allocation2 + $0x98] sm:$0xff] %vm25_vm0, %v1507_v43 }
  0x34   :  { %483 = vmatmul.bf16.gmra.mxu3 %v1286_v52  ;;  %512 = vmatmul.bf16.gmra.mxu1 %v1194_v53  ;;  %v1418_v52 = vld [vmem:[%s2158_s0 + $0x74] sm:$0xf0]  ;;  %v1433_v53 = vld [vmem:[%s2158_s0 + $0xf4] sm:$0xf]  ;;  %46 = vst.msk [vmem:[#allocation2 + $0xa0] sm:$0xff] %vm25_vm0, %v1507_v43 }
  0x35   :  { %1028 = vmatpush.msra.mxu2 %v915_v49  ;;  %v1238_v59 = vor.u32 %v1418_v52, %v1237_v51  ;;  %v1306_v60 = vor.u32 %v1433_v53, %v1303_v54  ;;  %47 = vst.msk [vmem:[#allocation2 + $0xa8] sm:$0xff] %vm25_vm0, %v1507_v43 }
  0x36   :  { %48 = vst.msk [vmem:[#allocation2 + $0xb0] sm:$0xff] %vm25_vm0, %v1507_v43 }
  0x37   :  { %1464 = vmatpush.bf16.msrb.mxu3 %v1616_v20  ;;  %v718_v20 = vld [vmem:[%s2160_s2 + $0xf0] sm:$0xff]  ;;  %1029 = vmatpush.msra.mxu2 %v914_v50  ;;  %49 = vst.msk [vmem:[#allocation2 + $0xb8] sm:$0xff] %vm25_vm0, %v1507_v43 }
  0x38   :  { %822 = vperm.xlu2 %1478, %v708_v57   ;;  %v1239_v57 = vld [vmem:[%s2158_s0 + $0x78] sm:$0xf0]  ;;  %50 = vst.msk [vmem:[#allocation2 + $0xc0] sm:$0xff] %vm25_vm0, %v1507_v43 }
  0x39   :  { %51 = vst.msk [vmem:[#allocation2 + $0xc8] sm:$0xff] %vm25_vm0, %v1507_v43 }
  0x3a   :  { %832 = vperm.xlu1 %1477, %v710_v55   ;;  %827 = vperm.xlu0 %1476, %v709_v56   ;;  %v913_v55 = vld [vmem:[%s2161_s3 + $0x8] sm:$0xff]  ;;  %v1417_v56 = vld [vmem:[%s2158_s0 + $0x74] sm:$0xf]  ;;  %52 = vst.msk [vmem:[#allocation2 + $0xd0] sm:$0xff] %vm25_vm0, %v1507_v43 }
  0x3b   :  { %1465 = vmatpush.bf16.msrb.mxu3 %v1631_v24  ;;  %v1279_v24 = vld [vmem:[%s2158_s0 + $0xc8] sm:$0xf0]  ;;  %1030 = vmatpush.msra.mxu2 %v913_v55  ;;  %v1242_v61 = vor.u32 %v1417_v56, %v1239_v57  ;;  %53 = vst.msk [vmem:[#allocation2 + $0xd8] sm:$0xff] %vm25_vm0, %v1507_v43 }
  0x3c   :  { %v1282_v28 = vor.u32 %v1427_v23, %v1279_v24  ;;  %54 = vst.msk [vmem:[#allocation2 + $0xe0] sm:$0xff] %vm25_vm0, %v1507_v43 }
  0x3d   :  { %1031 = vmatpush.msra.mxu2 %v912_v58  ;;  %55 = vst.msk [vmem:[#allocation2 + $0xe8] sm:$0xff] %vm25_vm0, %v1507_v43 }
  0x3e   :  { %56 = vst.msk [vmem:[#allocation2 + $0xf0] sm:$0xff] %vm25_vm0, %v1507_v43 }
  0x3f   :  { %1466 = vmatpush.bf16.msrb.mxu3 %v1642_v27  ;;  %v1214_v27 = vor.u32 %v1412_v22, %v1213_v21  ;;  %57 = vst.msk [vmem:[#allocation2 + $0xf8] sm:$0xff] %vm25_vm0, %v1507_v43  ;;  %v1423_v43 = vld [vmem:[%s2158_s0 + $0xa4] sm:$0xf] }
  0x40   :  { %857 = vperm.xlu2 %1478, %v715_v5   ;;  %v58_v5 = vld [vmem:[#allocation2] sm:$0xff] }
  0x42   :  { %862 = vperm.xlu1 %1477, %v716_v0   ;;  %837 = vperm.xlu0 %1476, %v711_v1   ;;  %v1419_v0 = vld [vmem:[%s2158_s0 + $0x84] sm:$0xf]  ;;  %v1247_v1 = vld [vmem:[%s2158_s0 + $0x88] sm:$0xf0] }
  0x43   :  { %428 = vmatmul.bf16.gmra.mxu0 %v1198_v2  ;;  %1467 = vmatpush.msra.mxu3 %v915_v49  ;;  %v1246_v2 = vor.u32 %v1420_v63, %v1245_v62  ;;  %v1266_v49 = vor.u32 %v1423_v43, %v1263_v44 }
  0x44   :  { %488 = vmatmul.bf16.gmra.mxu3 %v1294_v3  ;;  %517 = vmatmul.bf16.gmra.mxu1 %v1202_v4  ;;  %v1250_v4 = vor.u32 %v1419_v0, %v1247_v1  ;;  %v1269_v0 = vld [vmem:[%s2158_s0 + $0xb0] sm:$0xf]  ;;  %v1426_v1 = vld [vmem:[%s2158_s0 + $0xb4] sm:$0xf0] }
  0x45   :  { %1468 = vmatpush.msra.mxu3 %v914_v50  ;;  %v62_v50 = vld [vmem:[#allocation2 + $0x20] sm:$0xff] }
  0x47   :  { %1469 = vmatpush.msra.mxu3 %v913_v55 }
  0x48   :  { %842 = vperm.xlu2 %1478, %v712_v8  }
  0x49   :  { %1470 = vmatpush.msra.mxu3 %v912_v58 }
  0x4a   :  { %847 = vperm.xlu1 %1477, %v713_v6   ;;  %867 = vperm.xlu0 %1476, %v717_v7  }
  0x50   :  { %872 = vperm.xlu2 %1478, %v718_v20   ;;  %v1255_v20 = vld [vmem:[%s2158_s0 + $0x98] sm:$0xf0] }
  0x52   :  { %877 = vperm.xlu1 %1477, %v719_v15   ;;  %852 = vperm.xlu0 %1476, %v714_v16   ;;  %v1253_v16 = vld [vmem:[%s2158_s0 + $0x90] sm:$0xf] }
  0x53   :  { %433 = vmatmul.bf16.gmra.mxu0 %v1206_v17  ;;  %v1422_v17 = vld [vmem:[%s2158_s0 + $0x94] sm:$0xf0] }
  0x54   :  { %493 = vmatmul.bf16.gmra.mxu3 %v1302_v18  ;;  %522 = vmatmul.bf16.gmra.mxu1 %v1210_v19  ;;  %v1421_v19 = vld [vmem:[%s2158_s0 + $0x94] sm:$0xf]  ;;  %v1254_v23 = vor.u32 %v1422_v17, %v1253_v16 }
  0x55   :  { %v1258_v25 = vor.u32 %v1421_v19, %v1255_v20 }
  0x5f   :  { %v743_v53 = vpop.permute.xlu2 %742 }
  0x63   :  { %438 = vmatmul.bf16.gmra.mxu0 %v1214_v27 }
  0x64   :  { %567 = vmatmul.bf16.vlgmr.msrb.gmra.mxu3 %v1282_v28  ;;  %527 = vmatmul.bf16.gmra.mxu1 %v1218_v29 }
  0x73   :  { %443 = vmatmul.bf16.gmra.mxu0 %v1222_v36 }
  0x74   :  { %572 = vmatmul.bf16.gmra.mxu3 %v1290_v37  ;;  %532 = vmatmul.bf16.gmra.mxu1 %v1226_v38  ;;  %v723_v14 = vpop.permute.xlu0 %722  ;;  %v733_v38 = vpop.permute.xlu1 %732 }
  0x7c   :  { %v728_v30 = vpop.permute.xlu0 %727  ;;  %v738_v55 = vpop.permute.xlu1 %737 }
  0x83   :  { %448 = vmatmul.bf16.gmra.mxu0 %v1230_v46 }
  0x84   :  { %577 = vmatmul.bf16.gmra.mxu3 %v1298_v47  ;;  %537 = vmatmul.bf16.gmra.mxu1 %v1234_v48  ;;  %v1262_v47 = vor.u32 %v1424_v41, %v1261_v40  ;;  %v82_v41 = vld [vmem:[#allocation2 + $0xc0] sm:$0xff] }
  0x93   :  { %453 = vmatmul.bf16.gmra.mxu0 %v1238_v59 }
  0x94   :  { %582 = vmatmul.bf16.gmra.mxu3 %v1306_v60  ;;  %542 = vmatmul.bf16.gmra.mxu1 %v1242_v61  ;;  %v63_v60 = vld [vmem:[#allocation2 + $0x28] sm:$0xff] }
  0xa0   :  { %v419_v3 = vpop.f32.mrf.mxu0 }
  0xa1   :  { %v508_v6 = vpop.f32.mrf.mxu1 }
  0xa2   :  { %v509_v7 = vadd.f32 %v508_v6, %v419_v3  ;;  %v1425_v3 = vld [vmem:[%s2158_s0 + $0xb4] sm:$0xf] }
  0xa3   :  { %458 = vmatmul.bf16.gmra.mxu0 %v1246_v2 }
  0xa4   :  { %v588_v8 = vadd.f32 %v509_v7, %v58_v5  ;;  %547 = vmatmul.bf16.gmra.mxu1 %v1250_v4  ;;  %v1271_v4 = vld [vmem:[%s2158_s0 + $0xb8] sm:$0xf0]  ;;  %v748_v5 = vpop.permute.xlu2 %747 }
  0xa6   :  { %621 = vst.msk [vmem:[#allocation2] sm:$0xff] %vm25_vm0, %v588_v8  ;;  %v1270_v8 = vor.u32 %v1426_v1, %v1269_v0 }
  0xa7   :  { %v1950_v9 = vpop.f32.mrf.mxu3 }
  0xa8   :  { %v421_v10 = vpop.f32.mrf.mxu0 }
  0xa9   :  { %v510_v12 = vpop.f32.mrf.mxu1 }
  0xaa   :  { %v511_v13 = vadd.f32 %v510_v12, %v421_v10  ;;  %v64_v12 = vld [vmem:[#allocation2 + $0x30] sm:$0xff] }
  0xac   :  { %v589_v15 = vadd.f32 %v511_v13, %v59_v11  ;;  %v1274_v11 = vor.u32 %v1425_v3, %v1271_v4 }
  0xad   :  { %v656_v18 = vld [vmem:[#allocation2] sm:$0xff] }
  0xae   :  { %622 = vst.msk [vmem:[#allocation2 + $0x8] sm:$0xff] %vm25_vm0, %v589_v15  ;;  %v880_v22 = vmul.f32 %v723_v14, %v656_v18  ;;  %v753_v15 = vpop.permute.xlu0 %752  ;;  %v758_v18 = vpop.permute.xlu1 %757 }
  0xaf   :  { %v1965_v21 = vpop.f32.mrf.mxu3 }
  0xb0   :  { %1371 = vmatmul.msk.f32.vlgmr.msra.gmra.mxu2 %vm25_vm0, %v880_v22  ;;  %v424_v24 = vpop.f32.mrf.mxu0  ;;  %v763_v22 = vpop.permute.xlu2 %762 }
  0xb1   :  { %v513_v27 = vpop.f32.mrf.mxu1 }
  0xb2   :  { %v514_v28 = vadd.f32 %v513_v27, %v424_v24  ;;  %v65_v24 = vld [vmem:[#allocation2 + $0x38] sm:$0xff] }
  0xb3   :  { %463 = vmatmul.bf16.gmra.mxu0 %v1254_v23 }
  0xb4   :  { %v590_v29 = vadd.f32 %v514_v28, %v60_v26  ;;  %552 = vmatmul.bf16.gmra.mxu1 %v1258_v25 }
  0xb5   :  { %v657_v31 = vld [vmem:[#allocation2 + $0x8] sm:$0xff] }
  0xb6   :  { %623 = vst.msk [vmem:[#allocation2 + $0x10] sm:$0xff] %vm25_vm0, %v590_v29  ;;  %v881_v33 = vmul.f32 %v728_v30, %v657_v31  ;;  %v768_v29 = vpop.permute.xlu0 %767 }
  0xb7   :  { %v1969_v32 = vpop.f32.mrf.mxu3 }
  0xb8   :  { %1372 = vmatmul.msk.f32.gmra.mxu2 %vm25_vm0, %v881_v33  ;;  %v426_v34 = vpop.f32.mrf.mxu0  ;;  %v773_v33 = vpop.permute.xlu1 %772 }
  0xb9   :  { %v515_v36 = vpop.f32.mrf.mxu1 }
  0xba   :  { %v516_v37 = vadd.f32 %v515_v36, %v426_v34 }
  0xbc   :  { %v591_v39 = vadd.f32 %v516_v37, %v61_v35  ;;  %v66_v35 = vld [vmem:[#allocation2 + $0x40] sm:$0xff]  ;;  %v2016_v37 = vpop.permute.xlu2 %777 }
  0xbd   :  { %v658_v42 = vld [vmem:[#allocation2 + $0x10] sm:$0xff] }
  0xbe   :  { %624 = vst.msk [vmem:[#allocation2 + $0x18] sm:$0xff] %vm25_vm0, %v591_v39  ;;  %v882_v46 = vmul.f32 %v733_v38, %v658_v42 }
  0xbf   :  { %v1985_v45 = vpop.f32.mrf.mxu3 }
  0xc0   :  { %1373 = vmatmul.msk.f32.gmra.mxu2 %vm25_vm0, %v882_v46  ;;  %v429_v48 = vpop.f32.mrf.mxu0  ;;  %v2020_v46 = vpop.permute.xlu0 %782 }
  0xc1   :  { %v518_v51 = vpop.f32.mrf.mxu1 }
  0xc2   :  { %v519_v52 = vadd.f32 %v518_v51, %v429_v48  ;;  %v2023_v51 = vpop.permute.xlu1 %787 }
  0xc3   :  { %468 = vmatmul.bf16.gmra.mxu0 %v1262_v47 }
  0xc4   :  { %v592_v54 = vadd.f32 %v519_v52, %v62_v50  ;;  %557 = vmatmul.bf16.gmra.mxu1 %v1266_v49  ;;  %v67_v49 = vld [vmem:[#allocation2 + $0x48] sm:$0xff] }
  0xc5   :  { %v659_v56 = vld [vmem:[#allocation2 + $0x18] sm:$0xff] }
  0xc6   :  { %625 = vst.msk [vmem:[#allocation2 + $0x20] sm:$0xff] %vm25_vm0, %v592_v54  ;;  %v883_v58 = vmul.f32 %v738_v55, %v659_v56 }
  0xc7   :  { %v1989_v57 = vpop.f32.mrf.mxu3 }
  0xc8   :  { %1374 = vmatmul.msk.f32.gmra.mxu2 %vm25_vm0, %v883_v58  ;;  %v431_v59 = vpop.f32.mrf.mxu0  ;;  %v2031_v0 = vpop.permute.xlu0 %797 }
  0xc9   :  { %v520_v61 = vpop.f32.mrf.mxu1 }
  0xca   :  { %v521_v62 = vadd.f32 %v520_v61, %v431_v59 }
  0xcc   :  { %v593_v63 = vadd.f32 %v521_v62, %v63_v60  ;;  %v68_v62 = vld [vmem:[#allocation2 + $0x50] sm:$0xff] }
  0xcd   :  { %v660_v2 = vld [vmem:[#allocation2 + $0x20] sm:$0xff] }
  0xce   :  { %626 = vst.msk [vmem:[#allocation2 + $0x28] sm:$0xff] %vm25_vm0, %v593_v63  ;;  %v884_v7 = vmul.f32 %v743_v53, %v660_v2  ;;  %v2026_v53 = vpop.permute.xlu2 %792  ;;  %v2034_v2 = vpop.permute.xlu1 %802 }
  0xcf   :  { %v2005_v6 = vpop.f32.mrf.mxu3 }
  0xd0   :  { %1375 = vmatmul.msk.f32.gmra.mxu2 %vm25_vm0, %v884_v7  ;;  %v434_v10 = vpop.f32.mrf.mxu0 }
  0xd1   :  { %v523_v13 = vpop.f32.mrf.mxu1 }
  0xd2   :  { %v524_v14 = vadd.f32 %v523_v13, %v434_v10  ;;  %v69_v13 = vld [vmem:[#allocation2 + $0x58] sm:$0xff] }
  0xd3   :  { %473 = vmatmul.bf16.gmra.mxu0 %v1270_v8 }
  0xd4   :  { %v594_v16 = vadd.f32 %v524_v14, %v64_v12  ;;  %562 = vmatmul.bf16.gmra.mxu1 %v1274_v11 }
  0xd5   :  { %v661_v17 = vld [vmem:[#allocation2 + $0x28] sm:$0xff] }
  0xd6   :  { %627 = vst.msk [vmem:[#allocation2 + $0x30] sm:$0xff] %vm25_vm0, %v594_v16  ;;  %v885_v20 = vmul.f32 %v748_v5, %v661_v17  ;;  %v2036_v5 = vpop.permute.xlu2 %807  ;;  %v2042_v16 = vpop.permute.xlu0 %812 }
  0xd7   :  { %v2009_v19 = vpop.f32.mrf.mxu3 }
  0xd8   :  { %1376 = vmatmul.msk.f32.gmra.mxu2 %vm25_vm0, %v885_v20  ;;  %v436_v23 = vpop.f32.mrf.mxu0  ;;  %v2044_v20 = vpop.permute.xlu1 %817 }
  0xd9   :  { %v525_v25 = vpop.f32.mrf.mxu1 }
  0xda   :  { %v526_v26 = vadd.f32 %v525_v25, %v436_v23 }
  0xdc   :  { %v595_v27 = vadd.f32 %v526_v26, %v65_v24 }
  0xdd   :  { %v662_v28 = vld [vmem:[#allocation2 + $0x30] sm:$0xff] }
  0xde   :  { %628 = vst.msk [vmem:[#allocation2 + $0x38] sm:$0xff] %vm25_vm0, %v595_v27  ;;  %v886_v31 = vmul.f32 %v753_v15, %v662_v28  ;;  %v2048_v25 = vpop.permute.xlu2 %822  ;;  %v70_v28 = vld [vmem:[#allocation2 + $0x60] sm:$0xff] }
  0xdf   :  { %v2013_v30 = vpop.f32.mrf.mxu3 }
  0xe0   :  { %1377 = vmatmul.msk.f32.gmra.mxu2 %vm25_vm0, %v886_v31  ;;  %v439_v34 = vpop.f32.mrf.mxu0 }
  0xe1   :  { %v528_v36 = vpop.f32.mrf.mxu1 }
  0xe2   :  { %v529_v38 = vadd.f32 %v528_v36, %v439_v34  ;;  %v2052_v36 = vpop.permute.xlu0 %827 }
  0xe4   :  { %v596_v39 = vadd.f32 %v529_v38, %v66_v35 }
  0xe5   :  { %v663_v40 = vld [vmem:[#allocation2 + $0x38] sm:$0xff] }
  0xe6   :  { %629 = vst.msk [vmem:[#allocation2 + $0x40] sm:$0xff] %vm25_vm0, %v596_v39  ;;  %v887_v43 = vmul.f32 %v758_v18, %v663_v40  ;;  %v2057_v40 = vpop.permute.xlu1 %832 }
  0xe7   :  { %v568_v42 = vpop.f32.mrf.mxu3 }
  0xe8   :  { %v569_v44 = vadd.f32 %v568_v42, %v1950_v9  ;;  %1378 = vmatmul.msk.f32.gmra.mxu2 %vm25_vm0, %v887_v43  ;;  %v441_v47 = vpop.f32.mrf.mxu0  ;;  %v83_v9 = vld [vmem:[#allocation2 + $0xc8] sm:$0xff] }
  0xe9   :  { %v530_v50 = vpop.f32.mrf.mxu1  ;;  %v71_v43 = vld [vmem:[#allocation2 + $0x68] sm:$0xff] }
  0xea   :  { %v612_v48 = vadd.f32 %v569_v44, %v82_v41  ;;  %v531_v52 = vadd.f32 %v530_v50, %v441_v47  ;;  %v858_v47 = vpop.permute.xlu2 %857 }
  0xec   :  { %645 = vst.msk [vmem:[#allocation2 + $0xc0] sm:$0xff] %vm25_vm0, %v612_v48  ;;  %v597_v54 = vadd.f32 %v531_v52, %v67_v49 }
  0xed   :  { %v664_v55 = vld [vmem:[#allocation2 + $0x40] sm:$0xff] }
  0xee   :  { %630 = vst.msk [vmem:[#allocation2 + $0x48] sm:$0xff] %vm25_vm0, %v597_v54  ;;  %v888_v58 = vmul.f32 %v763_v22, %v664_v55  ;;  %v85_v22 = vld [vmem:[#allocation2 + $0xd8] sm:$0xff] }
  0xef   :  { %v570_v56 = vpop.f32.mrf.mxu3 }
  0xf0   :  { %v571_v59 = vadd.f32 %v570_v56, %v1965_v21  ;;  %1379 = vmatmul.msk.f32.gmra.mxu2 %vm25_vm0, %v888_v58  ;;  %v444_v60 = vpop.f32.mrf.mxu0  ;;  %v84_v21 = vld [vmem:[#allocation2 + $0xd0] sm:$0xff]  ;;  %v2065_v56 = vpop.permute.xlu0 %837 }
  0xf1   :  { %v533_v63 = vpop.f32.mrf.mxu1 }
  0xf2   :  { %v613_v61 = vadd.f32 %v571_v59, %v83_v9  ;;  %v534_v1 = vadd.f32 %v533_v63, %v444_v60  ;;  %v72_v60 = vld [vmem:[#allocation2 + $0x70] sm:$0xff] }
  0xf4   :  { %646 = vst.msk [vmem:[#allocation2 + $0xc8] sm:$0xff] %vm25_vm0, %v613_v61  ;;  %v598_v3 = vadd.f32 %v534_v1, %v68_v62  ;;  %v863_v62 = vpop.permute.xlu1 %862 }
  0xf5   :  { %v665_v4 = vld [vmem:[#allocation2 + $0x48] sm:$0xff] }
  0xf6   :  { %631 = vst.msk [vmem:[#allocation2 + $0x50] sm:$0xff] %vm25_vm0, %v598_v3  ;;  %v889_v8 = vmul.f32 %v768_v29, %v665_v4 }
  0xf7   :  { %v573_v7 = vpop.f32.mrf.mxu3 }
  0xf8   :  { %v574_v10 = vadd.f32 %v573_v7, %v1969_v32  ;;  %1380 = vmatmul.msk.f32.gmra.mxu2 %vm25_vm0, %v889_v8  ;;  %v446_v11 = vpop.f32.mrf.mxu0 }
  0xf9   :  { %v535_v14 = vpop.f32.mrf.mxu1 }
  0xfa   :  { %v614_v12 = vadd.f32 %v574_v10, %v84_v21  ;;  %v536_v15 = vadd.f32 %v535_v14, %v446_v11  ;;  %v2073_v10 = vpop.permute.xlu2 %842 }
  0xfc   :  { %647 = vst.msk [vmem:[#allocation2 + $0xd0] sm:$0xff] %vm25_vm0, %v614_v12  ;;  %v599_v17 = vadd.f32 %v536_v15, %v69_v13  ;;  %v73_v13 = vld [vmem:[#allocation2 + $0x78] sm:$0xff]  ;;  %v868_v15 = vpop.permute.xlu0 %867 }
  0xfd   :  { %v666_v18 = vld [vmem:[#allocation2 + $0x50] sm:$0xff] }
  0xfe   :  { %632 = vst.msk [vmem:[#allocation2 + $0x58] sm:$0xff] %vm25_vm0, %v599_v17  ;;  %v890_v32 = vmul.f32 %v773_v33, %v666_v18  ;;  %v86_v33 = vld [vmem:[#allocation2 + $0xe0] sm:$0xff] }
  0xff   :  { %v575_v23 = vpop.f32.mrf.mxu3 }
 0x100   :  { %v576_v24 = vadd.f32 %v575_v23, %v1985_v45  ;;  %1381 = vmatmul.msk.f32.gmra.mxu2 %vm25_vm0, %v890_v32  ;;  %v449_v26 = vpop.f32.mrf.mxu0 }
 0x101   :  { %v538_v29 = vpop.f32.mrf.mxu1 }
 0x102   :  { %v615_v27 = vadd.f32 %v576_v24, %v85_v22  ;;  %v539_v31 = vadd.f32 %v538_v29, %v449_v26 }
 0x104   :  { %648 = vst.msk [vmem:[#allocation2 + $0xd8] sm:$0xff] %vm25_vm0, %v615_v27  ;;  %v600_v34 = vadd.f32 %v539_v31, %v70_v28  ;;  %v2081_v27 = vpop.permute.xlu1 %847  ;;  %v74_v31 = vld [vmem:[#allocation2 + $0x80] sm:$0xff] }
 0x105   :  { %v667_v35 = vld [vmem:[#allocation2 + $0x58] sm:$0xff] }
 0x106   :  { %633 = vst.msk [vmem:[#allocation2 + $0x60] sm:$0xff] %vm25_vm0, %v600_v34  ;;  %v891_v45 = vmul.f32 %v2016_v37, %v667_v35  ;;  %v873_v35 = vpop.permute.xlu2 %872 }
 0x107   :  { %v578_v38 = vpop.f32.mrf.mxu3 }
 0x108   :  { %v579_v39 = vadd.f32 %v578_v38, %v1989_v57  ;;  %1382 = vmatmul.msk.f32.gmra.mxu2 %vm25_vm0, %v891_v45  ;;  %v451_v41 = vpop.f32.mrf.mxu0  ;;  %v87_v57 = vld [vmem:[#allocation2 + $0xe8] sm:$0xff] }
 0x109   :  { %v540_v44 = vpop.f32.mrf.mxu1 }
 0x10a   :  { %v616_v42 = vadd.f32 %v579_v39, %v86_v33  ;;  %v541_v48 = vadd.f32 %v540_v44, %v451_v41 }
 0x10b   :  { %v683_v49 = vld [vmem:[#allocation2 + $0xd8] sm:$0xff] }
 0x10c   :  { %649 = vst.msk [vmem:[#allocation2 + $0xe0] sm:$0xff] %vm25_vm0, %v616_v42  ;;  %v907_v50 = vmul.f32 %v858_v47, %v683_v49  ;;  %v601_v52 = vadd.f32 %v541_v48, %v71_v43  ;;  %v75_v42 = vld [vmem:[#allocation2 + $0x88] sm:$0xff]  ;;  %v878_v44 = vpop.permute.xlu1 %877 }
 0x10d   :  { %v668_v37 = vld [vmem:[#allocation2 + $0x60] sm:$0xff] }
 0x10e   :  { %1398 = vmatmul.msk.f32.vlgmr.msra.gmra.mxu3 %vm25_vm0, %v907_v50  ;;  %634 = vst.msk [vmem:[#allocation2 + $0x68] sm:$0xff] %vm25_vm0, %v601_v52  ;;  %v892_v55 = vmul.f32 %v2020_v46, %v668_v37 }
 0x10f   :  { %v580_v54 = vpop.f32.mrf.mxu3 }
 0x110   :  { %v581_v9 = vadd.f32 %v580_v54, %v2005_v6  ;;  %1383 = vmatmul.msk.f32.gmra.mxu2 %vm25_vm0, %v892_v55  ;;  %v454_v58 = vpop.f32.mrf.mxu0  ;;  %v88_v6 = vld [vmem:[#allocation2 + $0xf0] sm:$0xff] }
 0x111   :  { %v543_v61 = vpop.f32.mrf.mxu1  ;;  %v76_v54 = vld [vmem:[#allocation2 + $0x90] sm:$0xff] }
 0x112   :  { %v617_v59 = vadd.f32 %v581_v9, %v87_v57  ;;  %v544_v63 = vadd.f32 %v543_v61, %v454_v58  ;;  %v2096_v57 = vld [vmem:[%s2162_s4] ss:$0 sm:$0xff]  ;;  %s1508_s4 = smov [#allocation3]  }
 0x113   :  { %v684_v1 = vld [vmem:[#allocation2 + $0xe0] sm:$0xff]  ;;  %s1165_s14 = sshll.u32 %s1508_s4, 4  ;;  %s1166_s14 = int_to_ptr.vmem [resolvable:$true] %s1165_s14 }
 0x114   :  { %650 = vst.msk [vmem:[#allocation2 + $0xe8] sm:$0xff] %vm25_vm0, %v617_v59  ;;  %v908_v3 = vmul.f32 %v863_v62, %v684_v1  ;;  %v602_v4 = vadd.f32 %v544_v63, %v72_v60  ;;  %v77_v63 = vld [vmem:[#allocation2 + $0x98] sm:$0xff] }
 0x115   :  { %v669_v46 = vld [vmem:[#allocation2 + $0x68] sm:$0xff] }
 0x116   :  { %1399 = vmatmul.msk.f32.gmra.mxu3 %vm25_vm0, %v908_v3  ;;  %635 = vst.msk [vmem:[#allocation2 + $0x70] sm:$0xff] %vm25_vm0, %v602_v4  ;;  %v893_v7 = vmul.f32 %v2023_v51, %v669_v46 }
 0x117   :  { %v583_v21 = vpop.f32.mrf.mxu3 }
 0x118   :  { %v584_v8 = vadd.f32 %v583_v21, %v2009_v19  ;;  %1384 = vmatmul.msk.f32.gmra.mxu2 %vm25_vm0, %v893_v7  ;;  %v456_v11 = vpop.f32.mrf.mxu0  ;;  %v89_v19 = vld [vmem:[#allocation2 + $0xf8] sm:$0xff] }
 0x119   :  { %v545_v14 = vpop.f32.mrf.mxu1 }
 0x11a   :  { %v618_v12 = vadd.f32 %v584_v8, %v88_v6  ;;  %v546_v17 = vadd.f32 %v545_v14, %v456_v11  ;;  %v78_v8 = vld [vmem:[#allocation2 + $0xa0] sm:$0xff] }
 0x11b   :  { %v685_v18 = vld [vmem:[#allocation2 + $0xe8] sm:$0xff] }
 0x11c   :  { %651 = vst.msk [vmem:[#allocation2 + $0xf0] sm:$0xff] %vm25_vm0, %v618_v12  ;;  %v909_v22 = vmul.f32 %v868_v15, %v685_v18  ;;  %v603_v23 = vadd.f32 %v546_v17, %v73_v13 }
 0x11d   :  { %v670_v51 = vld [vmem:[#allocation2 + $0x70] sm:$0xff] }
 0x11e   :  { %1400 = vmatmul.msk.f32.gmra.mxu3 %vm25_vm0, %v909_v22  ;;  %636 = vst.msk [vmem:[#allocation2 + $0x78] sm:$0xff] %vm25_vm0, %v603_v23  ;;  %v894_v24 = vmul.f32 %v2026_v53, %v670_v51  ;;  %v79_v22 = vld [vmem:[#allocation2 + $0xa8] sm:$0xff] }
 0x11f   :  { %v585_v32 = vpop.f32.mrf.mxu3 }
 0x120   :  { %v586_v26 = vadd.f32 %v585_v32, %v2013_v30  ;;  %1385 = vmatmul.msk.f32.gmra.mxu2 %vm25_vm0, %v894_v24  ;;  %v459_v28 = vpop.f32.mrf.mxu0 }
 0x121   :  { %v548_v34 = vpop.f32.mrf.mxu1 }
 0x122   :  { %v619_v29 = vadd.f32 %v586_v26, %v89_v19  ;;  %v549_v33 = vadd.f32 %v548_v34, %v459_v28 }
 0x123   :  { %v686_v38 = vld [vmem:[#allocation2 + $0xf0] sm:$0xff] }
 0x124   :  { %652 = vst.msk [vmem:[#allocation2 + $0xf8] sm:$0xff] %vm25_vm0, %v619_v29  ;;  %v910_v45 = vmul.f32 %v873_v35, %v686_v38  ;;  %v604_v39 = vadd.f32 %v549_v33, %v74_v31  ;;  %v80_v29 = vld [vmem:[#allocation2 + $0xb0] sm:$0xff] }
 0x125   :  { %v671_v53 = vld [vmem:[#allocation2 + $0x78] sm:$0xff] }
 0x126   :  { %1401 = vmatmul.msk.f32.gmra.mxu3 %vm25_vm0, %v910_v45  ;;  %637 = vst.msk [vmem:[#allocation2 + $0x80] sm:$0xff] %vm25_vm0, %v604_v39  ;;  %v895_v30 = vmul.f32 %v2031_v0, %v671_v53  ;;  %v81_v53 = vld [vmem:[#allocation2 + $0xb8] sm:$0xff] }
 0x128   :  { %1386 = vmatmul.msk.f32.gmra.mxu2 %vm25_vm0, %v895_v30  ;;  %v461_v41 = vpop.f32.mrf.mxu0 }
 0x129   :  { %v550_v43 = vpop.f32.mrf.mxu1 }
 0x12a   :  { %v551_v47 = vadd.f32 %v550_v43, %v461_v41 }
 0x12b   :  { %v687_v48 = vld [vmem:[#allocation2 + $0xf8] sm:$0xff] }
 0x12c   :  { %v911_v49 = vmul.f32 %v878_v44, %v687_v48  ;;  %v605_v50 = vadd.f32 %v551_v47, %v75_v42 }
 0x12d   :  { %v672_v52 = vld [vmem:[#allocation2 + $0x80] sm:$0xff] }
 0x12e   :  { %1402 = vmatmul.msk.f32.gmra.mxu3 %vm25_vm0, %v911_v49  ;;  %638 = vst.msk [vmem:[#allocation2 + $0x88] sm:$0xff] %vm25_vm0, %v605_v50  ;;  %v896_v37 = vmul.f32 %v2034_v2, %v672_v52 }
 0x130   :  { %1387 = vmatmul.msk.f32.gmra.mxu2 %vm25_vm0, %v896_v37  ;;  %v464_v0 = vpop.f32.mrf.mxu0 }
 0x131   :  { %v553_v55 = vpop.f32.mrf.mxu1 }
 0x132   :  { %v554_v9 = vadd.f32 %v553_v55, %v464_v0  ;;  %v680_v0 = vld [vmem:[#allocation2 + $0xc0] sm:$0xff] }
 0x133   :  { %v1033_v58 = vpop.f32.mrf.mxu2  ;;  %v904_v55 = vmul.f32 %v2073_v10, %v680_v0 }
 0x134   :  { %v606_v59 = vadd.f32 %v554_v9, %v76_v54  ;;  %v1034_v60 = vadd.f32 %v2096_v57, %v1033_v58  ;;  %v681_v9 = vld [vmem:[#allocation2 + $0xc8] sm:$0xff] }
 0x135   :  { %v673_v61 = vld [vmem:[#allocation2 + $0x88] sm:$0xff] }
 0x136   :  { %639 = vst.msk [vmem:[#allocation2 + $0x90] sm:$0xff] %vm25_vm0, %v606_v59  ;;  %v897_v2 = vmul.f32 %v2036_v5, %v673_v61  ;;  %v905_v59 = vmul.f32 %v2081_v27, %v681_v9 }
 0x137   :  { %1129 = vst [vmem:[#allocation3] sm:$0xff] %v1034_v60  ;;  %v682_v60 = vld [vmem:[#allocation2 + $0xd0] sm:$0xff] }
 0x138   :  { %1388 = vmatmul.msk.f32.gmra.mxu2 %vm25_vm0, %v897_v2  ;;  %v466_v62 = vpop.f32.mrf.mxu0  ;;  %v853_v2 = vpop.permute.xlu0 %852 }
 0x139   :  { %v555_v1 = vpop.f32.mrf.mxu1 }
 0x13a   :  { %v556_v3 = vadd.f32 %v555_v1, %v466_v62  ;;  %v906_v62 = vmul.f32 %v853_v2, %v682_v60 }
 0x13b   :  { %v1036_v4 = vpop.f32.mrf.mxu2 }
 0x13c   :  { %v607_v46 = vadd.f32 %v556_v3, %v77_v63  ;;  %v1037_v6 = vadd.f32 %v2096_v57, %v1036_v4 }
 0x13d   :  { %v674_v21 = vld [vmem:[#allocation2 + $0x90] sm:$0xff] }
 0x13e   :  { %640 = vst.msk [vmem:[#allocation2 + $0x98] sm:$0xff] %vm25_vm0, %v607_v46  ;;  %v898_v7 = vmul.f32 %v2042_v16, %v674_v21 }
 0x13f   :  { %1130 = vst [vmem:[#allocation3 + $0x8] sm:$0xff] %v1037_v6 }
 0x140   :  { %1389 = vmatmul.msk.f32.gmra.mxu2 %vm25_vm0, %v898_v7  ;;  %v469_v5 = vpop.f32.mrf.mxu0 }
 0x141   :  { %v558_v11 = vpop.f32.mrf.mxu1 }
 0x142   :  { %v559_v12 = vadd.f32 %v558_v11, %v469_v5 }
 0x143   :  { %v1039_v13 = vpop.f32.mrf.mxu2 }
 0x144   :  { %v608_v14 = vadd.f32 %v559_v12, %v78_v8  ;;  %v1040_v15 = vadd.f32 %v2096_v57, %v1039_v13 }
 0x145   :  { %v675_v17 = vld [vmem:[#allocation2 + $0x98] sm:$0xff] }
 0x146   :  { %641 = vst.msk [vmem:[#allocation2 + $0xa0] sm:$0xff] %vm25_vm0, %v608_v14  ;;  %v899_v18 = vmul.f32 %v2044_v20, %v675_v17 }
 0x147   :  { %1131 = vst [vmem:[#allocation3 + $0x10] sm:$0xff] %v1040_v15 }
 0x148   :  { %1390 = vmatmul.msk.f32.gmra.mxu2 %vm25_vm0, %v899_v18  ;;  %v471_v16 = vpop.f32.mrf.mxu0 }
 0x149   :  { %v560_v23 = vpop.f32.mrf.mxu1 }
 0x14a   :  { %v561_v51 = vadd.f32 %v560_v23, %v471_v16 }
 0x14b   :  { %v1042_v19 = vpop.f32.mrf.mxu2 }
 0x14c   :  { %v609_v32 = vadd.f32 %v561_v51, %v79_v22  ;;  %v1043_v24 = vadd.f32 %v2096_v57, %v1042_v19 }
 0x14d   :  { %v676_v26 = vld [vmem:[#allocation2 + $0xa0] sm:$0xff] }
 0x14e   :  { %642 = vst.msk [vmem:[#allocation2 + $0xa8] sm:$0xff] %vm25_vm0, %v609_v32  ;;  %v900_v28 = vmul.f32 %v2048_v25, %v676_v26 }
 0x14f   :  { %1132 = vst [vmem:[#allocation3 + $0x18] sm:$0xff] %v1043_v24 }
 0x150   :  { %1391 = vmatmul.msk.f32.gmra.mxu2 %vm25_vm0, %v900_v28  ;;  %v474_v20 = vpop.f32.mrf.mxu0 }
 0x151   :  { %v563_v31 = vpop.f32.mrf.mxu1 }
 0x152   :  { %v564_v34 = vadd.f32 %v563_v31, %v474_v20 }
 0x153   :  { %v1045_v35 = vpop.f32.mrf.mxu2 }
 0x154   :  { %v610_v33 = vadd.f32 %v564_v34, %v80_v29  ;;  %v1046_v38 = vadd.f32 %v2096_v57, %v1045_v35 }
 0x155   :  { %v677_v45 = vld [vmem:[#allocation2 + $0xa8] sm:$0xff] }
 0x156   :  { %643 = vst.msk [vmem:[#allocation2 + $0xb0] sm:$0xff] %vm25_vm0, %v610_v33  ;;  %v901_v39 = vmul.f32 %v2052_v36, %v677_v45 }
 0x157   :  { %1133 = vst [vmem:[#allocation3 + $0x20] sm:$0xff] %v1046_v38 }
 0x158   :  { %1392 = vmatmul.msk.f32.gmra.mxu2 %vm25_vm0, %v901_v39  ;;  %v476_v25 = vpop.f32.mrf.mxu0 }
 0x159   :  { %v565_v30 = vpop.f32.mrf.mxu1 }
 0x15a   :  { %v566_v41 = vadd.f32 %v565_v30, %v476_v25 }
 0x15b   :  { %v1048_v42 = vpop.f32.mrf.mxu2 }
 0x15c   :  { %v611_v43 = vadd.f32 %v566_v41, %v81_v53  ;;  %v1049_v44 = vadd.f32 %v2096_v57, %v1048_v42 }
 0x15d   :  { %v678_v47 = vld [vmem:[#allocation2 + $0xb0] sm:$0xff] }
 0x15e   :  { %644 = vst.msk [vmem:[#allocation2 + $0xb8] sm:$0xff] %vm25_vm0, %v611_v43  ;;  %v902_v48 = vmul.f32 %v2057_v40, %v678_v47 }
 0x15f   :  { %1134 = vst [vmem:[#allocation3 + $0x28] sm:$0xff] %v1049_v44 }
 0x160   :  { %1393 = vmatmul.msk.f32.gmra.mxu2 %vm25_vm0, %v902_v48 }
 0x163   :  { %v1051_v36 = vpop.f32.mrf.mxu2 }
 0x164   :  { %v1052_v49 = vadd.f32 %v2096_v57, %v1051_v36 }
 0x165   :  { %v679_v50 = vld [vmem:[#allocation2 + $0xb8] sm:$0xff] }
 0x166   :  { %1135 = vst [vmem:[#allocation3 + $0x30] sm:$0xff] %v1052_v49  ;;  %v903_v52 = vmul.f32 %v2065_v56, %v679_v50 }
 0x168   :  { %1394 = vmatmul.msk.f32.gmra.mxu2 %vm25_vm0, %v903_v52 }
 0x16b   :  { %v1054_v37 = vpop.f32.mrf.mxu2 }
 0x16c   :  { %v1055_v54 = vadd.f32 %v2096_v57, %v1054_v37 }
 0x16e   :  { %1136 = vst [vmem:[#allocation3 + $0x38] sm:$0xff] %v1055_v54 }
 0x170   :  { %1395 = vmatmul.msk.f32.gmra.mxu2 %vm25_vm0, %v904_v55 }
 0x173   :  { %v1057_v40 = vpop.f32.mrf.mxu2 }
 0x174   :  { %v1058_v58 = vadd.f32 %v2096_v57, %v1057_v40 }
 0x176   :  { %1137 = vst [vmem:[#allocation3 + $0x40] sm:$0xff] %v1058_v58 }
 0x178   :  { %1396 = vmatmul.msk.f32.gmra.mxu2 %vm25_vm0, %v905_v59 }
 0x17b   :  { %v1060_v56 = vpop.f32.mrf.mxu2 }
 0x17c   :  { %v1061_v61 = vadd.f32 %v2096_v57, %v1060_v56 }
 0x17e   :  { %1138 = vst [vmem:[#allocation3 + $0x48] sm:$0xff] %v1061_v61 }
 0x180   :  { %1397 = vmatmul.msk.f32.gmra.mxu2 %vm25_vm0, %v906_v62 }
 0x183   :  { %v1063_v10 = vpop.f32.mrf.mxu2 }
 0x184   :  { %v1064_v63 = vadd.f32 %v2096_v57, %v1063_v10 }
 0x186   :  { %1139 = vst [vmem:[#allocation3 + $0x50] sm:$0xff] %v1064_v63 }
 0x18b   :  { %v1066_v1 = vpop.f32.mrf.mxu2 }
 0x18c   :  { %v1067_v3 = vadd.f32 %v2096_v57, %v1066_v1 }
 0x18e   :  { %1140 = vst [vmem:[#allocation3 + $0x58] sm:$0xff] %v1067_v3 }
 0x191   :  { %v1114_v27 = vpop.f32.mrf.mxu3 }
 0x192   :  { %v1115_v4 = vadd.f32 %v2096_v57, %v1114_v27 }
 0x193   :  { %v1069_v46 = vpop.f32.mrf.mxu2 }
 0x194   :  { %1156 = vst [vmem:[#allocation3 + $0xd8] sm:$0xff] %v1115_v4  ;;  %v1070_v6 = vadd.f32 %v2096_v57, %v1069_v46 }
 0x196   :  { %1141 = vst [vmem:[#allocation3 + $0x60] sm:$0xff] %v1070_v6 }
 0x199   :  { %v1117_v21 = vpop.f32.mrf.mxu3 }
 0x19a   :  { %v1118_v7 = vadd.f32 %v2096_v57, %v1117_v21 }
 0x19b   :  { %v1072_v5 = vpop.f32.mrf.mxu2 }
 0x19c   :  { %1157 = vst [vmem:[#allocation3 + $0xe0] sm:$0xff] %v1118_v7  ;;  %v1073_v8 = vadd.f32 %v2096_v57, %v1072_v5 }
 0x19e   :  { %1142 = vst [vmem:[#allocation3 + $0x68] sm:$0xff] %v1073_v8 }
 0x1a1   :  { %v1120_v11 = vpop.f32.mrf.mxu3 }
 0x1a2   :  { %v1121_v12 = vadd.f32 %v2096_v57, %v1120_v11 }
 0x1a3   :  { %v1075_v13 = vpop.f32.mrf.mxu2 }
 0x1a4   :  { %1158 = vst [vmem:[#allocation3 + $0xe8] sm:$0xff] %v1121_v12  ;;  %v1076_v14 = vadd.f32 %v2096_v57, %v1075_v13 }
 0x1a6   :  { %1143 = vst [vmem:[#allocation3 + $0x70] sm:$0xff] %v1076_v14 }
 0x1a9   :  { %v1123_v15 = vpop.f32.mrf.mxu3 }
 0x1aa   :  { %v1124_v17 = vadd.f32 %v2096_v57, %v1123_v15 }
 0x1ab   :  { %v1078_v18 = vpop.f32.mrf.mxu2 }
 0x1ac   :  { %1159 = vst [vmem:[#allocation3 + $0xf0] sm:$0xff] %v1124_v17  ;;  %v1079_v16 = vadd.f32 %v2096_v57, %v1078_v18 }
 0x1ae   :  { %1144 = vst [vmem:[#allocation3 + $0x78] sm:$0xff] %v1079_v16 }
 0x1b1   :  { %v1126_v22 = vpop.f32.mrf.mxu3 }
 0x1b2   :  { %v1127_v23 = vadd.f32 %v2096_v57, %v1126_v22 }
 0x1b3   :  { %v1081_v51 = vpop.f32.mrf.mxu2 }
 0x1b4   :  { %1160 = vst [vmem:[#allocation3 + $0xf8] sm:$0xff] %v1127_v23  ;;  %v1082_v19 = vadd.f32 %v2096_v57, %v1081_v51 }
 0x1b6   :  { %1145 = vst [vmem:[#allocation3 + $0x80] sm:$0xff] %v1082_v19 }
 0x1bb   :  { %v1084_v32 = vpop.f32.mrf.mxu2 }
 0x1bc   :  { %v1085_v24 = vadd.f32 %v2096_v57, %v1084_v32 }
 0x1be   :  { %1146 = vst [vmem:[#allocation3 + $0x88] sm:$0xff] %v1085_v24 }
 0x1c3   :  { %v1087_v26 = vpop.f32.mrf.mxu2 }
 0x1c4   :  { %v1088_v28 = vadd.f32 %v2096_v57, %v1087_v26 }
 0x1c6   :  { %1147 = vst [vmem:[#allocation3 + $0x90] sm:$0xff] %v1088_v28 }
 0x1cb   :  { %v1090_v20 = vpop.f32.mrf.mxu2 }
 0x1cc   :  { %v1091_v29 = vadd.f32 %v2096_v57, %v1090_v20 }
 0x1ce   :  { %1148 = vst [vmem:[#allocation3 + $0x98] sm:$0xff] %v1091_v29 }
 0x1d3   :  { %v1093_v31 = vpop.f32.mrf.mxu2 }
 0x1d4   :  { %v1094_v34 = vadd.f32 %v2096_v57, %v1093_v31 }
 0x1d6   :  { %1149 = vst [vmem:[#allocation3 + $0xa0] sm:$0xff] %v1094_v34 }
 0x1db   :  { %v1096_v35 = vpop.f32.mrf.mxu2 }
 0x1dc   :  { %v1097_v33 = vadd.f32 %v2096_v57, %v1096_v35 }
 0x1de   :  { %1150 = vst [vmem:[#allocation3 + $0xa8] sm:$0xff] %v1097_v33 }
 0x1e3   :  { %v1099_v38 = vpop.f32.mrf.mxu2 }
 0x1e4   :  { %v1100_v45 = vadd.f32 %v2096_v57, %v1099_v38 }
 0x1e6   :  { %1151 = vst [vmem:[#allocation3 + $0xb0] sm:$0xff] %v1100_v45 }
 0x1eb   :  { %v1102_v39 = vpop.f32.mrf.mxu2 }
 0x1ec   :  { %v1103_v25 = vadd.f32 %v2096_v57, %v1102_v39 }
 0x1ee   :  { %1152 = vst [vmem:[#allocation3 + $0xb8] sm:$0xff] %v1103_v25 }
 0x1f3   :  { %v1105_v53 = vpop.f32.mrf.mxu2 }
 0x1f4   :  { %v1106_v30 = vadd.f32 %v2096_v57, %v1105_v53 }
 0x1f6   :  { %1153 = vst [vmem:[#allocation3 + $0xc0] sm:$0xff] %v1106_v30 }
 0x1fb   :  { %v1108_v41 = vpop.f32.mrf.mxu2 }
 0x1fc   :  { %v1109_v42 = vadd.f32 %v2096_v57, %v1108_v41 }
 0x1fe   :  { %1154 = vst [vmem:[#allocation3 + $0xc8] sm:$0xff] %v1109_v42 }
 0x203   :  { %v1111_v43 = vpop.f32.mrf.mxu2 }
 0x204   :  { %v1112_v44 = vadd.f32 %v2096_v57, %v1111_v43 }
 0x206   :  { %1155 = vst [vmem:[#allocation3 + $0xd0] sm:$0xff] %v1112_v44 }
 0x207   :  { %1173 = dma.vmem_to_hbm [thread:$0]  %s1166_s14, 4096, %s1168_s16, [#allocation4], %s1509_s17, %s1509_s17, %s1510_s18  }
 0x208   :  { %1504 = dma.done.wait [#allocation4], 4096  }
 0x209   :  { %1505 = vsyncadd [#allocation4], 4294963200 }
 0x20a   :  { %1178 = vsyncpa [#allocation4], 1 }

</bundles_post_ra>
